<compile_context>
chip_gen: v7x
topology: tpu7x:2x2x1
jax: 0.10.0
libtpu: 0.0.40
codegen_flags: <defaults>
</compile_context>

<pallas_src>
from functools import partial

import jax
import jax.numpy as jnp
from jax.experimental import pallas as pl
from jax.experimental.pallas import tpu as pltpu


E_RAW = 200  # conv kernel width required by Conv2d(1, 1, (1, 200))


def _round_up(n, m):
    return ((n + m - 1) // m) * m


def identity_kernel(x_ref, cw_ref, cb_ref, w1_ref, b1_ref, w2_ref, b2_ref,
                    w3_ref, b3_ref, out_ref):
    # x_ref  : (BP, S, E)   f32  raw input (batch padded to multiple of 8)
    # cw_ref : (1, E)       f32  conv weight vector (VPU operand)
    # cb_ref : (1, 1)       f32  conv bias, SMEM scalar
    # w1_ref : (S, 512)     bf16   b1_ref: (1, 512)   f32
    # w2_ref : (512, H_PAD) bf16   b2_ref: (1, H_PAD) f32
    # w3_ref : (H_PAD,O_PAD)bf16   b3_ref: (1, O_PAD) f32
    # out_ref: (BP, O_PAD)  f32

    # conv1 (+bias) as VPU broadcast-multiply + lane reduction, then ReLU.
    h0 = jnp.sum(x_ref[...] * cw_ref[...], axis=-1) + cb_ref[0, 0]   # (BP, S)
    h0 = jnp.maximum(h0, 0.0)

    # fc1 + ReLU   (dropout p=0.0 -> identity)
    h1 = jnp.dot(h0.astype(jnp.bfloat16), w1_ref[...],
                 preferred_element_type=jnp.float32) + b1_ref[...]
    h1 = jnp.maximum(h1, 0.0)                                        # (BP, 512)

    # fc2 + ReLU   (dropout p=0.0 -> identity)
    h2 = jnp.dot(h1.astype(jnp.bfloat16), w2_ref[...],
                 preferred_element_type=jnp.float32) + b2_ref[...]
    h2 = jnp.maximum(h2, 0.0)                                        # (BP, H_PAD)

    # fc3 (no activation)
    out = jnp.dot(h2.astype(jnp.bfloat16), w3_ref[...],
                  preferred_element_type=jnp.float32) + b3_ref[...]
    out_ref[...] = out.astype(out_ref.dtype)                         # (BP, O_PAD)


def prepare_params(cw, cb, w1, b1, w2, b2, w3, b3):
    """Pad/cast parameters once into kernel-ready operands.

    MXU weights are bf16 (f32 accumulation in-kernel); biases and the conv
    weight stay f32 (VPU / elementwise path).
    """
    seq_len, fc1_out = w1.shape
    h_dim = w2.shape[1]
    out_dim = w3.shape[1]
    h_pad = _round_up(h_dim, 128)
    o_pad = _round_up(out_dim, 128)

    cw_vec = cw.reshape(1, E_RAW).astype(jnp.float32)                 # (1, E)
    cb_s = jnp.asarray(cb, jnp.float32).reshape(1, 1)                 # SMEM scalar

    w1p = w1.astype(jnp.bfloat16)                                     # (S, 512)
    b1p = b1.reshape(1, fc1_out).astype(jnp.float32)
    w2p = jnp.zeros((fc1_out, h_pad), jnp.bfloat16).at[:, :h_dim].set(
        w2.astype(jnp.bfloat16))
    b2p = jnp.zeros((1, h_pad), jnp.float32).at[:, :h_dim].set(
        b2.reshape(1, h_dim).astype(jnp.float32))
    w3p = jnp.zeros((h_pad, o_pad), jnp.bfloat16).at[:h_dim, :out_dim].set(
        w3.astype(jnp.bfloat16))
    b3p = jnp.zeros((1, o_pad), jnp.float32).at[:, :out_dim].set(
        b3.reshape(1, out_dim).astype(jnp.float32))
    return cw_vec, cb_s, w1p, b1p, w2p, b2p, w3p, b3p


@partial(jax.jit, static_argnames=("out_dim",))
def identity_forward(x, cw_vec, cb_s, w1p, b1p, w2p, b2p, w3p, b3p, *, out_dim):
    B, S, E = x.shape
    fc1_out = w1p.shape[1]
    h_pad = w2p.shape[1]
    o_pad = w3p.shape[1]

    # Pad batch rows to a whole (8,128) vreg sublane group; sliced back below.
    BP = _round_up(max(B, 8), 8)
    x_p = x.astype(jnp.float32)
    if BP != B:
        x_p = jnp.pad(x_p, ((0, BP - B), (0, 0), (0, 0)))

    flops = (2 * BP * S * E
             + 2 * BP * (S * fc1_out + fc1_out * h_pad + h_pad * o_pad))
    bytes_accessed = (x_p.size * 4 + cw_vec.size * 4 + 4
                      + (w1p.size + w2p.size + w3p.size) * 2
                      + (b1p.size + b2p.size + b3p.size) * 4
                      + BP * o_pad * 4)

    vmem = pl.BlockSpec(memory_space=pltpu.MemorySpace.VMEM)
    smem = pl.BlockSpec(memory_space=pltpu.MemorySpace.SMEM)
    out_padded = pl.pallas_call(
        identity_kernel,
        out_shape=jax.ShapeDtypeStruct((BP, o_pad), jnp.float32),
        in_specs=[vmem, vmem, smem, vmem, vmem, vmem, vmem, vmem, vmem],
        out_specs=vmem,
        cost_estimate=pl.CostEstimate(flops=flops, transcendentals=0,
                                      bytes_accessed=bytes_accessed),
    )(x_p, cw_vec, cb_s, w1p, b1p, w2p, b2p, w3p, b3p)
    return out_padded[:B, :out_dim]


def init_params(key, seq_len, embed, h_dim, out_dim):
    """Deterministic synthetic parameter init (shapes match the nn.Module)."""
    ks = jax.random.split(key, 8)
    # conv1: weight (1,1,1,200) -> flattened to (1,1,200); bias scalar -> (1,1)
    cw = jax.random.normal(ks[0], (1, 1, embed), jnp.float32) * (1.0 / jnp.sqrt(embed))
    cb = jnp.zeros((1, 1), jnp.float32) + 0.01
    # fc1: (512, seq_len) in torch -> stored transposed (seq_len, 512)
    w1 = jax.random.normal(ks[1], (seq_len, 512), jnp.float32) * (1.0 / jnp.sqrt(seq_len))
    b1 = jax.random.normal(ks[2], (1, 512), jnp.float32) * 0.01
    # fc2: (h_dim, 512) -> (512, h_dim)
    w2 = jax.random.normal(ks[3], (512, h_dim), jnp.float32) * (1.0 / jnp.sqrt(512.0))
    b2 = jax.random.normal(ks[4], (1, h_dim), jnp.float32) * 0.01
    # fc3: (out_dim, h_dim) -> (h_dim, out_dim)
    w3 = jax.random.normal(ks[5], (h_dim, out_dim), jnp.float32) * (1.0 / jnp.sqrt(h_dim))
    b3 = jax.random.normal(ks[6], (1, out_dim), jnp.float32) * 0.01
    return cw, cb, w1, b1, w2, b2, w3, b3


if __name__ == "__main__":
    B = 2          # batch
    SEQ_LEN = 16   # gene_num + 1 (small synthetic value)
    EMBED = 200    # width consumed by Conv2d(1, 1, (1, 200))
    H_DIM = 100
    OUT_DIM = 10

    key = jax.random.PRNGKey(0)
    kx, kp = jax.random.split(key)
    x = jax.random.normal(kx, (B, SEQ_LEN, EMBED), jnp.float32)
    cw, cb, w1, b1, w2, b2, w3, b3 = init_params(kp, SEQ_LEN, EMBED, H_DIM, OUT_DIM)

    # Prepare (pad/cast) weights once, outside the per-call path.
    padded = prepare_params(cw, cb, w1, b1, w2, b2, w3, b3)

    out = identity_forward(x, *padded, out_dim=OUT_DIM)
    out = jax.block_until_ready(out)

    # Pure-JAX reference of the same module math (unpadded, f32 params).
    ref = jnp.maximum(jnp.sum(x * cw, axis=-1) + cb[0, 0], 0.0)
    ref = jnp.maximum(ref @ w1 + b1, 0.0)
    ref = jnp.maximum(ref @ w2 + b2, 0.0)
    ref = ref @ w3 + b3

    assert out.shape == (B, OUT_DIM)
    # Tolerance accounts for bf16 MXU inputs (f32 accumulation) in the kernel
    # vs. the reference's default-precision f32 matmuls.
    assert jnp.allclose(out, ref, atol=1e-2, rtol=1e-2), float(jnp.max(jnp.abs(out - ref)))
    print("KERNEL_OK")
</pallas_src>

<mosaic_0001>
module attributes {stable_mosaic.version = 11 : i64} {
  func.func @identity_kernel(%arg0: memref<8x16x200xf32, #tpu.memory_space<vmem>>, %arg1: memref<1x200xf32, #tpu.memory_space<vmem>>, %arg2: memref<1x1xf32, #tpu.memory_space<smem>>, %arg3: memref<16x512xbf16, #tpu.memory_space<vmem>>, %arg4: memref<1x512xf32, #tpu.memory_space<vmem>>, %arg5: memref<512x128xbf16, #tpu.memory_space<vmem>>, %arg6: memref<1x128xf32, #tpu.memory_space<vmem>>, %arg7: memref<128x128xbf16, #tpu.memory_space<vmem>>, %arg8: memref<1x128xf32, #tpu.memory_space<vmem>>, %arg9: memref<8x128xf32, #tpu.memory_space<vmem>>) attributes {dimension_semantics = [], scalar_prefetch = 0 : i64, scratch_operands = 0 : i64, tpu.core_type = #tpu.core_type<tc>} {
    %c0 = arith.constant 0 : index
    %c0_0 = arith.constant 0 : index
    %c0_1 = arith.constant 0 : index
    %0 = vector.load %arg0[%c0, %c0_0, %c0_1] : memref<8x16x200xf32, #tpu.memory_space<vmem>>, vector<8x16x200xf32>
    %c0_2 = arith.constant 0 : index
    %c0_3 = arith.constant 0 : index
    %1 = vector.load %arg1[%c0_2, %c0_3] : memref<1x200xf32, #tpu.memory_space<vmem>>, vector<1x200xf32>
    %2 = vector.shape_cast %1 : vector<1x200xf32> to vector<1x1x200xf32>
    %3 = vector.broadcast %2 : vector<1x1x200xf32> to vector<8x16x200xf32>
    %4 = arith.mulf %0, %3 : vector<8x16x200xf32>
    %cst = arith.constant dense<0.000000e+00> : vector<8x16xf32>
    %5 = vector.multi_reduction <add>, %4, %cst [2] : vector<8x16x200xf32> to vector<8x16xf32>
    %c0_4 = arith.constant 0 : index
    %c0_5 = arith.constant 0 : index
    %6 = memref.load %arg2[%c0_4, %c0_5] : memref<1x1xf32, #tpu.memory_space<smem>>
    %7 = vector.broadcast %6 : f32 to vector<8x16xf32>
    %8 = arith.addf %5, %7 : vector<8x16xf32>
    %cst_6 = arith.constant 0.000000e+00 : f32
    %9 = vector.broadcast %cst_6 : f32 to vector<8x16xf32>
    %10 = arith.maximumf %8, %9 : vector<8x16xf32>
    %11 = arith.truncf %10 : vector<8x16xf32> to vector<8x16xbf16>
    %c0_7 = arith.constant 0 : index
    %c0_8 = arith.constant 0 : index
    %12 = vector.load %arg3[%c0_7, %c0_8] : memref<16x512xbf16, #tpu.memory_space<vmem>>, vector<16x512xbf16>
    %cst_9 = arith.constant dense<0.000000e+00> : vector<8x512xf32>
    %13 = tpu.matmul %11, %12, %cst_9 {dimension_numbers = #tpu.dot_dimension_numbers<[1], [0], [0], [1], [0, 0, 1, 1], [], []>} : vector<8x16xbf16>, vector<16x512xbf16>, vector<8x512xf32> -> vector<8x512xf32>
    %c0_10 = arith.constant 0 : index
    %c0_11 = arith.constant 0 : index
    %14 = vector.load %arg4[%c0_10, %c0_11] : memref<1x512xf32, #tpu.memory_space<vmem>>, vector<1x512xf32>
    %15 = vector.broadcast %14 : vector<1x512xf32> to vector<8x512xf32>
    %16 = arith.addf %13, %15 : vector<8x512xf32>
    %cst_12 = arith.constant 0.000000e+00 : f32
    %17 = vector.broadcast %cst_12 : f32 to vector<8x512xf32>
    %18 = arith.maximumf %16, %17 : vector<8x512xf32>
    %19 = arith.truncf %18 : vector<8x512xf32> to vector<8x512xbf16>
    %c0_13 = arith.constant 0 : index
    %c0_14 = arith.constant 0 : index
    %20 = vector.load %arg5[%c0_13, %c0_14] : memref<512x128xbf16, #tpu.memory_space<vmem>>, vector<512x128xbf16>
    %cst_15 = arith.constant dense<0.000000e+00> : vector<8x128xf32>
    %21 = tpu.matmul %19, %20, %cst_15 {dimension_numbers = #tpu.dot_dimension_numbers<[1], [0], [0], [1], [0, 0, 1, 1], [], []>} : vector<8x512xbf16>, vector<512x128xbf16>, vector<8x128xf32> -> vector<8x128xf32>
    %c0_16 = arith.constant 0 : index
    %c0_17 = arith.constant 0 : index
    %22 = vector.load %arg6[%c0_16, %c0_17] : memref<1x128xf32, #tpu.memory_space<vmem>>, vector<1x128xf32>
    %23 = vector.broadcast %22 : vector<1x128xf32> to vector<8x128xf32>
    %24 = arith.addf %21, %23 : vector<8x128xf32>
    %cst_18 = arith.constant 0.000000e+00 : f32
    %25 = vector.broadcast %cst_18 : f32 to vector<8x128xf32>
    %26 = arith.maximumf %24, %25 : vector<8x128xf32>
    %27 = arith.truncf %26 : vector<8x128xf32> to vector<8x128xbf16>
    %c0_19 = arith.constant 0 : index
    %c0_20 = arith.constant 0 : index
    %28 = vector.load %arg7[%c0_19, %c0_20] : memref<128x128xbf16, #tpu.memory_space<vmem>>, vector<128x128xbf16>
    %cst_21 = arith.constant dense<0.000000e+00> : vector<8x128xf32>
    %29 = tpu.matmul %27, %28, %cst_21 {dimension_numbers = #tpu.dot_dimension_numbers<[1], [0], [0], [1], [0, 0, 1, 1], [], []>} : vector<8x128xbf16>, vector<128x128xbf16>, vector<8x128xf32> -> vector<8x128xf32>
    %c0_22 = arith.constant 0 : index
    %c0_23 = arith.constant 0 : index
    %30 = vector.load %arg8[%c0_22, %c0_23] : memref<1x128xf32, #tpu.memory_space<vmem>>, vector<1x128xf32>
    %31 = vector.broadcast %30 : vector<1x128xf32> to vector<8x128xf32>
    %32 = arith.addf %29, %31 : vector<8x128xf32>
    %c0_24 = arith.constant 0 : index
    %c0_25 = arith.constant 0 : index
    %33 = vector.load %arg9[%c0_24, %c0_25] : memref<8x128xf32, #tpu.memory_space<vmem>>, vector<8x128xf32>
    tpu.vector_store %arg9[%c0_24, %c0_25], %32 {strides = array<i32>} : memref<8x128xf32, #tpu.memory_space<vmem>>, vector<8x128xf32>,
    return
  }
}

</mosaic_0001>

<bundles_post_ra>
// kernel: identity_forward.1
= control target key start
LH: loop header
LB: loop body
LE: loop exit
PB: predicated region body
PF: predicated region fallthrough
CT: control target
= control target key end

     0   :  { %15 = vsyncpa [#allocation4], 0  ;;  %s1145_s30 = smov [#allocation3]   ;;  %s1568_s0 = inlined_call_operand.vmem [shape: f32[8,16,200], index: 0, kind: input, shape index: {}]   ;;  %s1569_s1 = inlined_call_operand.vmem [shape: f32[1,200], index: 1, kind: input, shape index: {}]   ;;  %s1570_s2 = inlined_call_operand.<no memory space> [shape: f32[1,1], index: 2, kind: input, shape index: {}]   ;;  %s1571_s3 = inlined_call_operand.hbm [shape: bf16[16,512], index: 3, kind: input, shape index: {}]   ;;  %s1572_s4 = inlined_call_operand.vmem [shape: f32[1,512], index: 4, kind: input, shape index: {}]   ;;  %s1573_s5 = inlined_call_operand.vmem [shape: bf16[512,128], index: 5, kind: input, shape index: {}]   ;;  %s1574_s6 = inlined_call_operand.vmem [shape: f32[1,128], index: 6, kind: input, shape index: {}]   ;;  %s1575_s7 = inlined_call_operand.vmem [shape: bf16[128,128], index: 7, kind: input, shape index: {}]   ;;  %s1576_s8 = inlined_call_operand.vmem [shape: f32[1,128], index: 8, kind: input, shape index: {}]   ;;  %s1577_s9 = inlined_call_operand.vmem [shape: f32[8,128], index: 9, kind: output, shape index: {}]  }
   0x1   :  { %s27_s10 = sshll.u32 %s1145_s30, 4  ;;  %s1121_s13 = scalar_lea.hbm %s1571_s3, 512  ;;  %s28_s10 = int_to_ptr.vmem [resolvable:$true] %s27_s10 }
   0x2   :  { %p1122_p0 = scmp.ne.s32.totalorder %s1571_s3, %s1121_s13  ;;  %p1125_p1 = scmp.lt.u32.totalorder %s1121_s13, %s1571_s3 }
   0x4   :  { %p1127_p2 = pnand %p1125_p1, %p1122_p0 }
   0x6   :  { %1130 = shalt.err (!%p1127_p2)
}
   0x7   :  { %s1131_s18 = scalar_lea.vmem %s28_s10, 512  ;;  %p1136_p4 = scmp.lt.s32.totalorder %s28_s10, %s28_s10 }
   0x8   :  { %p1132_p3 = scmp.ne.s32.totalorder %s28_s10, %s1131_s18  ;;  %p1137_p5 = scmp.lt.s32.totalorder %s1131_s18, %s1131_s18 }
   0xa   :  { %p1138_p6 = por %p1137_p5, %p1136_p4 }
   0xc   :  { %p1139_p7 = pnand %p1138_p6, %p1132_p3 }
   0xe   :  { %1142 = shalt.err (!%p1139_p7)
}
   0xf   :  { %s1146_s19 = smov 256   ;;  %s1147_s20 = smov 16  }
  0x10   :  { %33 = dma.hbm_to_vmem [thread:$0]  %s1571_s3, 512, %s28_s10, [#allocation4], %s1146_s19, %s1146_s19, %s1147_s20  }
  0x11   :  { %1143 = dma.done.wait [#allocation4], 512  }
  0x12   :  { %1144 = vsyncadd [#allocation4], 4294966784  ;;  %v82_v0 = vlaneseq  ;;  %v52_v4 = vld [vmem:[%s1568_s0 + $0x20] sm:$0xff]  ;;  %v53_v5 = vld [vmem:[%s1568_s0 + $0x28] sm:$0xff]  ;;  %vm124_vm0 = vcmask 588800   ;;  %vm292_vm1 = vcmask 130112  }
  0x13   :  { %v80_v6 = vld [vmem:[%s1569_s1] sm:$0x3]  ;;  %v49_v10 = vld [vmem:[%s1568_s0 + $0x8] sm:$0xff]  ;;  %v54_v11 = vld [vmem:[%s1568_s0 + $0x30] sm:$0xff]  ;;  %vm357_vm2 = vcmask 1041409   ;;  %vm359_vm3 = vcmask 1042434  }
  0x14   :  { %v1214_v1 = vshrl.u32 %v82_v0, 7  ;;  %v48_v9 = vld [vmem:[%s1568_s0] sm:$0xff]  ;;  %v55_v12 = vld [vmem:[%s1568_s0 + $0x38] sm:$0xff]  ;;  %v50_v13 = vld [vmem:[%s1568_s0 + $0x10] sm:$0xff]  ;;  %vm361_vm4 = vcmask 1043459   ;;  %vm363_vm5 = vcmask 1044484  }
  0x15   :  { %v51_v14 = vld [vmem:[%s1568_s0 + $0x18] sm:$0xff]  ;;  %v58_v24 = vld [vmem:[%s1568_s0 + $0x50] sm:$0xff]  ;;  %v56_v28 = vld [vmem:[%s1568_s0 + $0x40] sm:$0xff]  ;;  %vm365_vm6 = vcmask 1045509   ;;  %vm367_vm7 = vcmask 1046534   ;;  %vm369_vm8 = vcmask 1047559  }
  0x16   :  { %v84_v2 = vsub.s32 0, %v1214_v1  ;;  %v88_v3 = vsub.s32 1, %v1214_v1  ;;  %v59_v19 = vld [vmem:[%s1568_s0 + $0x58] sm:$0xff]  ;;  %v57_v29 = vld [vmem:[%s1568_s0 + $0x48] sm:$0xff]  ;;  %v62_v42 = vld [vmem:[%s1568_s0 + $0x70] sm:$0xff]  ;;  %vm392_vm9 = vcmask 130048  }
  0x17   :  { %v63_v34 = vld [vmem:[%s1568_s0 + $0x78] sm:$0xff]  ;;  %v61_v35 = vld [vmem:[%s1568_s0 + $0x68] sm:$0xff]  ;;  %v60_v43 = vld [vmem:[%s1568_s0 + $0x60] sm:$0xff]  ;;  %vm1150_vm10 = vmmov 0  }
  0x18   :  { %v1229_v7 = vrot.slane %v80_v6, %v84_v2  ;;  %v1233_v8 = vrot.slane %v80_v6, %v88_v3  ;;  %v67_v44 = vld [vmem:[%s1568_s0 + $0x98] sm:$0xff]  ;;  %v65_v47 = vld [vmem:[%s1568_s0 + $0x88] sm:$0xff]  ;;  %v66_v49 = vld [vmem:[%s1568_s0 + $0x90] sm:$0xff] }
  0x19   :  { %v64_v50 = vld [vmem:[%s1568_s0 + $0x80] sm:$0xff]  ;;  %v71_v55 = vld [vmem:[%s1568_s0 + $0xb8] sm:$0xff]  ;;  %v69_v60 = vld [vmem:[%s1568_s0 + $0xa8] sm:$0xff] }
  0x1a   :  { %v96_v15 = vmul.f32 %v1229_v7, %v52_v4  ;;  %v97_v16 = vmul.f32 %v1233_v8, %v53_v5  ;;  %v92_v17 = vmul.f32 %v1229_v7, %v48_v9  ;;  %v93_v18 = vmul.f32 %v1233_v8, %v49_v10  ;;  %v70_v61 = vld [vmem:[%s1568_s0 + $0xb0] sm:$0xff]  ;;  %v68_v62 = vld [vmem:[%s1568_s0 + $0xa0] sm:$0xff]  ;;  %v75_v9 = vld [vmem:[%s1568_s0 + $0xd8] sm:$0xff] }
  0x1b   :  { %v98_v20 = vmul.f32 %v1229_v7, %v54_v11  ;;  %v99_v21 = vmul.f32 %v1233_v8, %v55_v12  ;;  %v94_v22 = vmul.f32 %v1229_v7, %v50_v13  ;;  %v95_v23 = vmul.f32 %v1233_v8, %v51_v14  ;;  %v73_v10 = vld [vmem:[%s1568_s0 + $0xc8] sm:$0xff] }
  0x1c   :  { %v133_v25 = vsel %vm124_vm0, %v97_v16, 0.0  ;;  %v125_v26 = vsel %vm124_vm0, %v93_v18, 0.0  ;;  %v103_v27 = vmul.f32 %v1233_v8, %v59_v19  ;;  %v102_v37 = vmul.f32 %v1229_v7, %v58_v24  ;;  %v77_v16 = vld [vmem:[%s1568_s0 + $0xe8] sm:$0xff]  ;;  %v72_v18 = vld [vmem:[%s1568_s0 + $0xc0] sm:$0xff] }
  0x1d   :  { %v134_v30 = vadd.f32 %v133_v25, %v96_v15  ;;  %v126_v31 = vadd.f32 %v125_v26, %v92_v17  ;;  %v137_v32 = vsel %vm124_vm0, %v99_v21, 0.0  ;;  %v129_v33 = vsel %vm124_vm0, %v95_v23, 0.0  ;;  %v79_v15 = vld [vmem:[%s1568_s0 + $0xf8] sm:$0xff]  ;;  %v74_v17 = vld [vmem:[%s1568_s0 + $0xd0] sm:$0xff] }
  0x1e   :  { %v138_v36 = vadd.f32 %v137_v32, %v98_v20  ;;  %v130_v38 = vadd.f32 %v129_v33, %v94_v22  ;;  %v145_v39 = vsel %vm124_vm0, %v103_v27, 0.0  ;;  %v100_v40 = vmul.f32 %v1229_v7, %v56_v28  ;;  %v78_v27 = vld [vmem:[%s1568_s0 + $0xf0] sm:$0xff]  ;;  %v76_v32 = vld [vmem:[%s1568_s0 + $0xe0] sm:$0xff] }
  0x1f   :  { %135 = vadd.xlane.f32.xlu1 %v134_v30  ;;  %127 = vadd.xlane.f32.xlu0 %v126_v31  ;;  %v101_v41 = vmul.f32 %v1233_v8, %v57_v29  ;;  %v107_v45 = vmul.f32 %v1233_v8, %v63_v34  ;;  %v105_v46 = vmul.f32 %v1233_v8, %v61_v35 }
  0x20   :  { %v146_v51 = vadd.f32 %v145_v39, %v102_v37  ;;  %v106_v52 = vmul.f32 %v1229_v7, %v62_v42  ;;  %v104_v53 = vmul.f32 %v1229_v7, %v60_v43  ;;  %v111_v54 = vmul.f32 %v1233_v8, %v67_v44  ;;  %v1075_v44 = vld [vmem:[#allocation3 + $0x4] ss:$16 sps:$4 sm:$0xff]  }
  0x21   :  { %v141_v48 = vsel %vm124_vm0, %v101_v41, 0.0  ;;  %v153_v57 = vsel %vm124_vm0, %v107_v45, 0.0  ;;  %v149_v58 = vsel %vm124_vm0, %v105_v46, 0.0  ;;  %v109_v59 = vmul.f32 %v1233_v8, %v65_v47  ;;  %v1077_v45 = vld [vmem:[#allocation3] ss:$16 sps:$4 sm:$0xff]   ;;  %396 = vmatprep.subr.bf16.mxu1 %v1075_v44 }
  0x22   :  { %v142_v56 = vadd.f32 %v141_v48, %v100_v40  ;;  %v154_v63 = vadd.f32 %v153_v57, %v106_v52  ;;  %v150_v4 = vadd.f32 %v149_v58, %v104_v53  ;;  %v110_v5 = vmul.f32 %v1229_v7, %v66_v49  ;;  %v1080_v47 = vld [vmem:[#allocation3 + $0xc] ss:$16 sps:$4 sm:$0xff]   ;;  %397 = vmatpush1.bf16.msra.mxu1 %v1077_v45  ;;  %v1081_v48 = vld [vmem:[%s1573_s5 + $0x40] sm:$0xff]   ;;  %v1087_v52 = vld [vmem:[%s1573_s5 + $0x10] sm:$0xff]  }
  0x23   :  { %139 = vadd.xlane.f32.xlu1 %v138_v36  ;;  %131 = vadd.xlane.f32.xlu0 %v130_v38  ;;  %v108_v6 = vmul.f32 %v1229_v7, %v64_v50  ;;  %v161_v11 = vsel %vm124_vm0, %v111_v54, 0.0  ;;  %v157_v12 = vsel %vm124_vm0, %v109_v59, 0.0  ;;  %v115_v13 = vmul.f32 %v1233_v8, %v71_v55  ;;  %v1083_v49 = vld [vmem:[%s1573_s5 + $0x48] sm:$0xff]   ;;  %v1089_v53 = vld [vmem:[%s1573_s5 + $0x58] sm:$0xff]   ;;  %v1093_v55 = vld [vmem:[%s1573_s5 + $0x60] sm:$0xff]  }
  0x24   :  { %v113_v14 = vmul.f32 %v1233_v8, %v69_v60  ;;  %v162_v19 = vadd.f32 %v161_v11, %v110_v5  ;;  %v114_v21 = vmul.f32 %v1229_v7, %v70_v61  ;;  %v112_v22 = vmul.f32 %v1229_v7, %v68_v62  ;;  %437 = vmatprep.subr.bf16.mxu1 %v1080_v47  ;;  %v1084_v50 = vld [vmem:[%s1573_s5 + $0x8] sm:$0xff]   ;;  %v1091_v54 = vld [vmem:[%s1573_s5 + $0x18] sm:$0xff]  }
  0x25   :  { %v158_v20 = vadd.f32 %v157_v12, %v108_v6  ;;  %v169_v23 = vsel %vm124_vm0, %v115_v13, 0.0  ;;  %v119_v25 = vmul.f32 %v1233_v8, %v75_v9  ;;  %v117_v26 = vmul.f32 %v1233_v8, %v73_v10  ;;  %996 = vmatprep.subr.bf16.mxu0 %v1081_v48  ;;  %v1097_v57 = vld [vmem:[%s1573_s5 + $0x68] sm:$0xff]  }
  0x26   :  { %v165_v24 = vsel %vm124_vm0, %v113_v14, 0.0  ;;  %v123_v28 = vmul.f32 %v1233_v8, %v79_v15  ;;  %v121_v29 = vmul.f32 %v1233_v8, %v77_v16  ;;  %v118_v30 = vmul.f32 %v1229_v7, %v74_v17  ;;  %v1099_v58 = vld [vmem:[%s1573_s5 + $0x28] sm:$0xff]  }
  0x27   :  { %147 = vadd.xlane.f32.xlu1 %v146_v51  ;;  %143 = vadd.xlane.f32.xlu0 %v142_v56  ;;  %v116_v31 = vmul.f32 %v1229_v7, %v72_v18  ;;  %v170_v33 = vadd.f32 %v169_v23, %v114_v21  ;;  %v166_v34 = vadd.f32 %v165_v24, %v112_v22  ;;  %v177_v35 = vsel %vm124_vm0, %v119_v25, 0.0  ;;  %v1085_v51 = vld [vmem:[%s1573_s5 + $0x50] sm:$0xff]   ;;  %v1095_v56 = vld [vmem:[%s1573_s5 + $0x20] sm:$0xff]  }
  0x28   :  { %v173_v36 = vsel %vm124_vm0, %v117_v26, 0.0  ;;  %v185_v37 = vsel %vm124_vm0, %v123_v28, 0.0  ;;  %v181_v8 = vsel %vm124_vm0, %v121_v29, 0.0  ;;  %v122_v38 = vmul.f32 %v1229_v7, %v78_v27 }
  0x29   :  { %v178_v39 = vadd.f32 %v177_v35, %v118_v30  ;;  %v174_v40 = vadd.f32 %v173_v36, %v116_v31  ;;  %v120_v41 = vmul.f32 %v1229_v7, %v76_v32  ;;  %v1148_v46 = vmov 0   ;;  %v1082_v7 = vld [vmem:[%s1573_s5] sm:$0xff]  }
  0x2a   :  { %v186_v42 = vadd.f32 %v185_v37, %v122_v38  ;;  %428 = vmatprep.mubr.bf16.mxu1 %v1148_v46  ;;  %997 = vmatpush3.bf16.msra.mxu0 %v1082_v7  ;;  %v282_v11 = vand.u32 127, %v82_v0 }
  0x2b   :  { %155 = vadd.xlane.f32.xlu1 %v154_v63  ;;  %151 = vadd.xlane.f32.xlu0 %v150_v4  ;;  %v182_v43 = vadd.f32 %v181_v8, %v120_v41  ;;  %v1413_v63 = vstv %s1570_s2 }
  0x2c   :  { %998 = vmatprep.subr.bf16.mxu0 %v1083_v49 }
  0x2e   :  { %999 = vmatpush3.bf16.msra.mxu0 %v1084_v50 }
  0x2f   :  { %163 = vadd.xlane.f32.xlu1 %v162_v19  ;;  %159 = vadd.xlane.f32.xlu0 %v158_v20  ;;  %v287_v20 = vadd.s32 4294967288, %v282_v11 }
  0x30   :  { %1000 = vmatprep.subr.bf16.mxu0 %v1085_v51 }
  0x32   :  { %1001 = vmatpush3.bf16.msra.mxu0 %v1087_v52 }
  0x33   :  { %171 = vadd.xlane.f32.xlu1 %v170_v33  ;;  %167 = vadd.xlane.f32.xlu0 %v166_v34  ;;  %v1427_v33 = vsub.s32 %v282_v11, %v1214_v1  ;;  %v1430_v34 = vsub.s32 %v287_v20, %v1214_v1 }
  0x34   :  { %1002 = vmatprep.subr.bf16.mxu0 %v1089_v53 }
  0x36   :  { %1003 = vmatpush3.bf16.msra.mxu0 %v1091_v54 }
  0x37   :  { %179 = vadd.xlane.f32.xlu1 %v178_v39  ;;  %175 = vadd.xlane.f32.xlu0 %v174_v40 }
  0x38   :  { %1004 = vmatprep.subr.bf16.mxu0 %v1093_v55 }
  0x3a   :  { %1005 = vmatpush3.bf16.msra.mxu0 %v1095_v56 }
  0x3b   :  { %187 = vadd.xlane.f32.xlu1 %v186_v42  ;;  %183 = vadd.xlane.f32.xlu0 %v182_v43 }
  0x3c   :  { %1006 = vmatprep.subr.bf16.mxu0 %v1097_v57 }
  0x3e   :  { %1007 = vmatpush3.bf16.msra.mxu0 %v1099_v58 }
  0xac   :  { %v136_v59 = vpop.xlane.xlu1 %135  ;;  %v128_v60 = vpop.xlane.xlu0 %127 }
  0xad   :  { %v193_v5 = vadd.f32 %v1413_v63, %v136_v59  ;;  %v191_v12 = vadd.f32 %v1413_v63, %v128_v60 }
  0xaf   :  { %v209_v16 = vmax.f32 %v193_v5, 0.0  ;;  %v207_v21 = vmax.f32 %v191_v12, 0.0 }
  0xb0   :  { %v140_v61 = vpop.xlane.xlu1 %139  ;;  %v132_v62 = vpop.xlane.xlu0 %131 }
  0xb1   :  { %v194_v4 = vadd.f32 %v1413_v63, %v140_v61  ;;  %v192_v6 = vadd.f32 %v1413_v63, %v132_v62 }
  0xb3   :  { %v210_v13 = vmax.f32 %v194_v4, 0.0  ;;  %v208_v17 = vmax.f32 %v192_v6, 0.0 }
  0xb4   :  { %v148_v9 = vpop.xlane.xlu1 %147  ;;  %v144_v10 = vpop.xlane.xlu0 %143 }
  0xb5   :  { %v196_v14 = vadd.f32 %v1413_v63, %v148_v9  ;;  %v195_v15 = vadd.f32 %v1413_v63, %v144_v10  ;;  %v224_v22 = vpack.c.bf16 %v210_v13, %v209_v16  ;;  %v223_v26 = vpack.c.bf16 %v208_v17, %v207_v21 }
  0xb7   :  { %v212_v25 = vmax.f32 %v196_v14, 0.0  ;;  %v211_v0 = vmax.f32 %v195_v15, 0.0  ;;  %v267_v35 = vunpack.c.l.b16 %v224_v22  ;;  %v268_v36 = vunpack.c.h.b16 %v224_v22 }
  0xb8   :  { %v156_v18 = vpop.xlane.xlu1 %155  ;;  %v152_v19 = vpop.xlane.xlu0 %151  ;;  %v265_v39 = vunpack.c.l.b16 %v223_v26  ;;  %v266_v42 = vunpack.c.h.b16 %v223_v26 }
  0xb9   :  { %v198_v23 = vadd.f32 %v1413_v63, %v156_v18  ;;  %v197_v24 = vadd.f32 %v1413_v63, %v152_v19  ;;  %v225_v37 = vpack.c.bf16 %v212_v25, %v211_v0  ;;  %v297_v48 = vrot.slane %v267_v35, %v1427_v33 }
  0xba   :  { %v301_v7 = vrot.slane %v268_v36, %v1430_v34  ;;  %v286_v50 = vrot.slane %v265_v39, %v1427_v33  ;;  %v291_v56 = vrot.slane %v266_v42, %v1430_v34 }
  0xbb   :  { %v214_v29 = vmax.f32 %v198_v23, 0.0  ;;  %v213_v30 = vmax.f32 %v197_v24, 0.0  ;;  %v269_v49 = vunpack.c.l.b16 %v225_v37  ;;  %v270_v51 = vunpack.c.h.b16 %v225_v37 }
  0xbc   :  { %v164_v27 = vpop.xlane.xlu1 %163  ;;  %v160_v28 = vpop.xlane.xlu0 %159  ;;  %v302_v5 = vsel %vm292_vm1, %v301_v7, %v297_v48  ;;  %v293_v20 = vsel %vm292_vm1, %v291_v56, %v286_v50  ;;  %v1078_v7 = vld [vmem:[#allocation3 + $0x8] ss:$16 sps:$4 sm:$0xff]   ;;  %v1101_v56 = vld [vmem:[%s1573_s5 + $0x70] sm:$0xff]  }
  0xbd   :  { %v200_v31 = vadd.f32 %v1413_v63, %v164_v27  ;;  %v199_v32 = vadd.f32 %v1413_v63, %v160_v28  ;;  %v226_v43 = vpack.c.bf16 %v214_v29, %v213_v30  ;;  %v306_v6 = vrot.slane %v269_v49, %v1427_v33  ;;  %1008 = vmatprep.subr.bf16.mxu0 %v1101_v56 }
  0xbe   :  { %v310_v10 = vrot.slane %v270_v51, %v1430_v34  ;;  %v1086_v51 = vld [vmem:[%s1573_s5 + $0xc0] sm:$0xff]  }
  0xbf   :  { %v216_v8 = vmax.f32 %v200_v31, 0.0  ;;  %v215_v38 = vmax.f32 %v199_v32, 0.0  ;;  %v271_v57 = vunpack.c.l.b16 %v226_v43  ;;  %v272_v58 = vunpack.c.h.b16 %v226_v43 }
  0xc0   :  { %v172_v40 = vpop.xlane.xlu1 %171  ;;  %v168_v41 = vpop.xlane.xlu0 %167  ;;  %v311_v27 = vsel %vm292_vm1, %v310_v10, %v306_v6  ;;  %v358_v31 = vsel %vm357_vm2, %v302_v5, %v293_v20  ;;  %v1109_v5 = vld [vmem:[%s1573_s5 + $0xf0] sm:$0xff]   ;;  %v1112_v10 = vld [vmem:[%s1573_s5 + $0xb8] sm:$0xff]  }
  0xc1   :  { %v227_v44 = vpack.c.bf16 %v216_v8, %v215_v38  ;;  %v202_v45 = vadd.f32 %v1413_v63, %v172_v40  ;;  %v201_v47 = vadd.f32 %v1413_v63, %v168_v41  ;;  %v315_v16 = vrot.slane %v271_v57, %v1427_v33  ;;  %v1102_v57 = vld [vmem:[%s1573_s5 + $0xe0] sm:$0xff]   ;;  %v1110_v6 = vld [vmem:[%s1573_s5 + $0xb0] sm:$0xff]  }
  0xc2   :  { %v319_v17 = vrot.slane %v272_v58, %v1430_v34  ;;  %v360_v37 = vsel %vm359_vm3, %v311_v27, %v358_v31  ;;  %v1103_v58 = vld [vmem:[%s1573_s5 + $0x30] sm:$0xff]  }
  0xc3   :  { %v218_v52 = vmax.f32 %v202_v45, 0.0  ;;  %v217_v53 = vmax.f32 %v201_v47, 0.0  ;;  %v273_v60 = vunpack.c.l.b16 %v227_v44  ;;  %v274_v61 = vunpack.c.h.b16 %v227_v44  ;;  %1009 = vmatpush3.bf16.msra.mxu0 %v1103_v58 }
  0xc4   :  { %v180_v54 = vpop.xlane.xlu1 %179  ;;  %v176_v55 = vpop.xlane.xlu0 %175 }
  0xc5   :  { %v204_v59 = vadd.f32 %v1413_v63, %v180_v54  ;;  %v228_v62 = vpack.c.bf16 %v218_v52, %v217_v53  ;;  %v203_v4 = vadd.f32 %v1413_v63, %v176_v55  ;;  %v324_v21 = vrot.slane %v273_v60, %v1427_v33  ;;  %v1092_v52 = vld [vmem:[%s1573_s5 + $0x88] sm:$0xff]   ;;  %v1096_v53 = vld [vmem:[%s1573_s5 + $0x90] sm:$0xff]   ;;  %v1098_v54 = vld [vmem:[%s1573_s5 + $0xd8] sm:$0xff]  }
  0xc6   :  { %v328_v22 = vrot.slane %v274_v61, %v1430_v34  ;;  %v1100_v55 = vld [vmem:[%s1573_s5 + $0x98] sm:$0xff]   ;;  %v1106_v61 = vld [vmem:[%s1573_s5 + $0xe8] sm:$0xff]  }
  0xc7   :  { %v220_v9 = vmax.f32 %v204_v59, 0.0  ;;  %v275_v11 = vunpack.c.l.b16 %v228_v62  ;;  %v276_v12 = vunpack.c.h.b16 %v228_v62  ;;  %v219_v13 = vmax.f32 %v203_v4, 0.0  ;;  %v1104_v59 = vld [vmem:[%s1573_s5 + $0xa0] sm:$0xff]   ;;  %v1105_v60 = vld [vmem:[%s1573_s5 + $0x78] sm:$0xff]   ;;  %v1108_v4 = vld [vmem:[%s1573_s5 + $0xa8] sm:$0xff]  }
  0xc8   :  { %v188_v14 = vpop.xlane.xlu1 %187  ;;  %v184_v15 = vpop.xlane.xlu0 %183  ;;  %v329_v32 = vsel %vm292_vm1, %v328_v22, %v324_v21  ;;  %v1107_v62 = vld [vmem:[%s1573_s5 + $0x38] sm:$0xff]   ;;  %1010 = vmatprep.subr.bf16.mxu0 %v1105_v60  ;;  %v251_v21 = vsub.s32 3, %v1214_v1 }
  0xc9   :  { %v206_v18 = vadd.f32 %v1413_v63, %v188_v14  ;;  %v205_v19 = vadd.f32 %v1413_v63, %v184_v15  ;;  %v229_v23 = vpack.c.bf16 %v220_v9, %v219_v13  ;;  %v333_v24 = vrot.slane %v275_v11, %v1427_v33  ;;  %1011 = vmatpush3.bf16.msra.mxu0 %v1107_v62  ;;  %v1111_v9 = vld [vmem:[%s1573_s5 + $0xf8] sm:$0xff]  }
  0xca   :  { %v337_v25 = vrot.slane %v276_v12, %v1430_v34  ;;  %v320_v63 = vsel %vm292_vm1, %v319_v17, %v315_v16  ;;  %v1149_v11 = vmov 0.0   ;;  %v235_v12 = vld [vmem:[%s1572_s4] sm:$0xf] }
  0xcb   :  { %v222_v0 = vmax.f32 %v206_v18, 0.0  ;;  %v221_v26 = vmax.f32 %v205_v19, 0.0  ;;  %v277_v28 = vunpack.c.l.b16 %v229_v23  ;;  %v278_v29 = vunpack.c.h.b16 %v229_v23  ;;  %1049 = vmatprep.subr.bf16.mxu0 %v1149_v11 }
  0xcc   :  { %v338_v8 = vsel %vm292_vm1, %v337_v25, %v333_v24  ;;  %v362_v40 = vsel %vm361_vm4, %v320_v63, %v360_v37  ;;  %v240_v13 = vrot.slane %v235_v12, %v84_v2  ;;  %v244_v14 = vrot.slane %v235_v12, %v88_v3  ;;  %v1113_v2 = vld [vmem:[%s1575_s7] sm:$0xff]   ;;  %v1115_v37 = vld [vmem:[%s1575_s7 + $0x10] sm:$0xff]  }
  0xcd   :  { %v230_v30 = vpack.c.bf16 %v222_v0, %v221_v26  ;;  %v342_v35 = vrot.slane %v277_v28, %v1427_v33  ;;  %v346_v36 = vrot.slane %v278_v29, %v1430_v34  ;;  %v364_v42 = vsel %vm363_vm5, %v329_v32, %v362_v40  ;;  %v1118_v40 = vld [vmem:[%s1575_s7 + $0x28] sm:$0xff]  }
  0xce   :  { %v366_v45 = vsel %vm365_vm6, %v338_v8, %v364_v42  ;;  %v247_v18 = vsub.s32 2, %v1214_v1  ;;  %v252_v26 = vrot.slane %v235_v12, %v251_v21  ;;  %v1114_v1 = vld [vmem:[%s1575_s7 + $0x8] sm:$0xff]   ;;  %v1120_v42 = vld [vmem:[%s1575_s7 + $0x38] sm:$0xff]  }
  0xcf   :  { %v279_v38 = vunpack.c.l.b16 %v230_v30  ;;  %v280_v39 = vunpack.c.h.b16 %v230_v30  ;;  %v347_v41 = vsel %vm292_vm1, %v346_v36, %v342_v35 }
  0xd0   :  { %v368_v48 = vsel %vm367_vm7, %v347_v41, %v366_v45  ;;  %v248_v25 = vrot.slane %v235_v12, %v247_v18  ;;  %v1119_v41 = vld [vmem:[%s1575_s7 + $0x30] sm:$0xff]  }
  0xd1   :  { %v351_v43 = vrot.slane %v279_v38, %v1427_v33  ;;  %v355_v44 = vrot.slane %v280_v39, %v1430_v34  ;;  %v1088_v33 = vld [vmem:[%s1573_s5 + $0x80] sm:$0xff]   ;;  %v1090_v34 = vld [vmem:[%s1573_s5 + $0xc8] sm:$0xff]   ;;  %v1116_v38 = vld [vmem:[%s1575_s7 + $0x18] sm:$0xff]  }
  0xd2   :  { %v1117_v39 = vld [vmem:[%s1575_s7 + $0x20] sm:$0xff]  }
  0xd3   :  { %v356_v47 = vsel %vm292_vm1, %v355_v44, %v351_v43 }
  0xd4   :  { %v370_v49 = vsel %vm369_vm8, %v356_v47, %v368_v48 }
  0xd5   :  { %v371_v50 = vpack.c.b16 %v370_v49, %v370_v49 }
  0xd7   :  { %952 = vmatmul.mubr.msk.bf16.vlgmr.msra.gmra.mrb[0].mxu1 %vm392_vm9, %v371_v50 }
  0xd8   :  { %438 = vmatpush1.bf16.msra.mxu1 %v1078_v7  ;;  %469 = vmatprep.mubr.bf16.mxu1 %v1148_v46  ;;  %v1094_v46 = vld [vmem:[%s1573_s5 + $0xd0] sm:$0xff]   ;;  %v954_v7 = vld [vmem:[%s1574_s6] ss:$0 sm:$0xff] }
  0xd9   :  { %1018 = vmatprep.subr.bf16.mxu1 %v1086_v51 }
  0xdf   :  { %953 = vmatmul.mubr.msk.bf16.vlgmr.msra.gmra.mrb[4].mxu1 %vm392_vm9, %v371_v50 }
  0xe0   :  { %1019 = vmatpush3.bf16.msra.mxu1 %v1088_v33 }
  0xe1   :  { %1020 = vmatprep.subr.bf16.mxu1 %v1090_v34 }
  0xe4   :  { %1021 = vmatpush3.bf16.msra.mxu1 %v1092_v52 }
  0xe5   :  { %1022 = vmatprep.subr.bf16.mxu1 %v1094_v46 }
  0xe8   :  { %1023 = vmatpush3.bf16.msra.mxu1 %v1096_v53 }
  0xe9   :  { %1024 = vmatprep.subr.bf16.mxu1 %v1098_v54 }
  0xec   :  { %1025 = vmatpush3.bf16.msra.mxu1 %v1100_v55  ;;  %v987_v55 = vld [vmem:[%s1576_s8] ss:$0 sm:$0xff] }
  0xed   :  { %1026 = vmatprep.subr.bf16.mxu1 %v1102_v57 }
  0xf0   :  { %1027 = vmatpush3.bf16.msra.mxu1 %v1104_v59 }
  0xf1   :  { %1028 = vmatprep.subr.bf16.mxu1 %v1106_v61 }
  0xf4   :  { %1029 = vmatpush3.bf16.msra.mxu1 %v1108_v4 }
  0xf5   :  { %1030 = vmatprep.subr.bf16.mxu1 %v1109_v5 }
  0xf8   :  { %1031 = vmatpush3.bf16.msra.mxu1 %v1110_v6 }
  0xf9   :  { %1032 = vmatprep.subr.bf16.mxu1 %v1111_v9 }
  0xfc   :  { %1033 = vmatpush3.bf16.msra.mxu1 %v1112_v10 }
 0x1aa   :  { %v430_v15 = vpop.f32.mrb[0].mxu1 }
 0x1ab   :  { %v431_v16 = vadd.f32 %v430_v15, %v240_v13  ;;  %v432_v17 = vpop.f32.mrb[1].mxu1 }
 0x1ac   :  { %v433_v19 = vadd.f32 %v432_v17, %v244_v14  ;;  %v434_v20 = vpop.f32.mrb[2].mxu1 }
 0x1ad   :  { %v478_v22 = vmax.f32 %v431_v16, 0.0  ;;  %v435_v23 = vpop.f32.mrb[3].mxu1 }
 0x1ae   :  { %v479_v24 = vmax.f32 %v433_v19, 0.0 }
 0x1af   :  { %v482_v3 = vpack.c.bf16 %v478_v22, %v478_v22 }
 0x1b0   :  { %v483_v0 = vpack.c.bf16 %v479_v24, %v479_v24 }
 0x1b2   :  { %v471_v27 = vpop.f32.mrb[4].mxu1  ;;  %781 = vmatprep.mubr.bf16.mxu0 %v483_v0 }
 0x1b3   :  { %v472_v28 = vadd.f32 %v471_v27, %v248_v25  ;;  %v473_v29 = vpop.f32.mrb[5].mxu1  ;;  %782 = vmatmul.mubr.bf16.vlgmr.msra.gmra.mrb[0].mxu0 %v482_v3 }
 0x1b4   :  { %v474_v63 = vadd.f32 %v473_v29, %v252_v26  ;;  %v475_v30 = vpop.f32.mrb[6].mxu1  ;;  %1050 = vmatpush3.bf16.msra.mxu0 %v1113_v2  ;;  %1065 = vmatprep.mubr.msk.bf16.mxu0 %vm1150_vm10, %v1149_v11 }
 0x1b5   :  { %v480_v31 = vmax.f32 %v472_v28, 0.0  ;;  %v476_v32 = vpop.f32.mrb[7].mxu1  ;;  %1051 = vmatprep.subr.bf16.mxu0 %v1149_v11 }
 0x1b6   :  { %v481_v35 = vmax.f32 %v474_v63, 0.0 }
 0x1b7   :  { %v484_v8 = vpack.c.bf16 %v480_v31, %v480_v31 }
 0x1b8   :  { %v485_v36 = vpack.c.bf16 %v481_v35, %v481_v35  ;;  %1052 = vmatpush3.bf16.msra.mxu0 %v1114_v1 }
 0x1b9   :  { %1053 = vmatprep.subr.bf16.mxu0 %v1149_v11 }
 0x1ba   :  { %821 = vmatprep.mubr.bf16.mxu1 %v485_v36 }
 0x1bb   :  { %822 = vmatmul.mubr.bf16.vlgmr.msra.gmra.mrb[8].mxu1 %v484_v8 }
 0x1bc   :  { %1054 = vmatpush3.bf16.msra.mxu0 %v1115_v37 }
 0x1bd   :  { %1055 = vmatprep.subr.bf16.mxu0 %v1149_v11 }
 0x1c0   :  { %1056 = vmatpush3.bf16.msra.mxu0 %v1116_v38 }
 0x1c1   :  { %1057 = vmatprep.subr.bf16.mxu0 %v1149_v11 }
 0x1c4   :  { %1058 = vmatpush3.bf16.msra.mxu0 %v1117_v39 }
 0x1c5   :  { %1059 = vmatprep.subr.bf16.mxu0 %v1149_v11 }
 0x1c8   :  { %1060 = vmatpush3.bf16.msra.mxu0 %v1118_v40 }
 0x1c9   :  { %1061 = vmatprep.subr.bf16.mxu0 %v1149_v11 }
 0x1cc   :  { %1062 = vmatpush3.bf16.msra.mxu0 %v1119_v41 }
 0x1cd   :  { %1063 = vmatprep.subr.bf16.mxu0 %v1149_v11 }
 0x1d0   :  { %1064 = vmatpush3.bf16.msra.mxu0 %v1120_v42 }
 0x286   :  { %v1012_v43 = vpop.f32.mrb[0].mxu0 }
 0x287   :  { %v1013_v44 = vpop.f32.mrb[1].mxu0 }
 0x288   :  { %v1014_v45 = vadd.f32 %v1013_v44, %v1012_v43  ;;  %v1015_v47 = vpop.f32.mrb[2].mxu0 }
 0x289   :  { %v1016_v48 = vpop.f32.mrb[3].mxu0 }
 0x28a   :  { %v784_v51 = vadd.f32 %v1014_v45, %v954_v7 }
 0x28e   :  { %v1034_v49 = vpop.f32.mrb[8].mxu1 }
 0x28f   :  { %v1035_v50 = vpop.f32.mrb[9].mxu1 }
 0x290   :  { %v1036_v33 = vadd.f32 %v1035_v50, %v1034_v49  ;;  %v1037_v34 = vpop.f32.mrb[10].mxu1 }
 0x291   :  { %v1038_v52 = vpop.f32.mrb[11].mxu1 }
 0x292   :  { %v824_v46 = vadd.f32 %v1036_v33, %v784_v51 }
 0x294   :  { %v829_v53 = vmax.f32 %v824_v46, 0.0 }
 0x296   :  { %v830_v54 = vpack.c.bf16 %v829_v53, %v829_v53 }
 0x298   :  { %1066 = vmatmul.mubr.bf16.vlgmr.msra.gmra.mrb[4].mxu0 %v830_v54 }
 0x36b   :  { %v936_v56 = vpop.f32.mrb[4].mxu0 }
 0x36c   :  { %v937_v57 = vadd.f32 %v987_v55, %v936_v56  ;;  %v1067_v58 = vpop.f32.mrb[5].mxu0 }
 0x36d   :  { %v939_v59 = vpop.f32.mrb[6].mxu0 }
 0x36e   :  { %942 = vst [vmem:[%s1577_s9] sm:$0xff] %v937_v57  ;;  %v1068_v60 = vpop.f32.mrb[7].mxu0 }
 0x36f   :  { %947 = vsyncpa [#allocation4], 1 }

</bundles_post_ra>
